<compile_context>
chip_gen: v7x
topology: tpu7x:2x2x1
jax: 0.10.0
libtpu: 0.0.40
codegen_flags: <defaults>
</compile_context>

<pallas_src>
import functools

import jax
import jax.numpy as jnp
from jax import lax
from jax.experimental import pallas as pl
from jax.experimental.pallas import tpu as pltpu


def _round_up(x, m):
    return (x + m - 1) // m * m


# ------------------------------------------------------------------ Pallas kernels

def _conv_mm_kernel(p_ref, w_ref, shift_ref, o_ref, acc_ref, *, leaky):
    """Tiled im2col-matmul (bf16 MXU, f32 accum) + fused shift (BN/bias) + LeakyReLU."""
    @pl.when(pl.program_id(2) == 0)
    def _init():
        acc_ref[...] = jnp.zeros_like(acc_ref)

    acc_ref[...] += jnp.dot(p_ref[...], w_ref[...],
                            preferred_element_type=jnp.float32)

    @pl.when(pl.program_id(2) == pl.num_programs(2) - 1)
    def _finalize():
        acc = acc_ref[...] + shift_ref[...]
        if leaky:
            acc = jnp.where(acc > 0, acc, 0.1 * acc)
        o_ref[...] = acc


def _max_reduce_kernel(x_ref, o_ref):
    """Max over the leading (window-tap) axis: (KK, tr, 128) -> (tr, 128)."""
    o_ref[...] = jnp.max(x_ref[...], axis=0)


def _add_kernel(a_ref, b_ref, o_ref):
    o_ref[...] = a_ref[...] + b_ref[...]


def _yolo_kernel(p_ref, o_ref, *, stride, g, anchors):
    """YOLO head transform on a (g*g, 5+nc) block; block index = batch*num_anchors + a."""
    na = len(anchors)
    a_idx = pl.program_id(0) % na

    p = p_ref[...]                                   # (g*g, 5+nc) f32
    rows = p.shape[0]
    sig = 1.0 / (1.0 + jnp.exp(-p))

    col = lax.broadcasted_iota(jnp.int32, p.shape, 1)
    is_wh = (col == 2) | (col == 3)
    # exp only of the w/h logits (masked) -> no inf from large objectness/class logits.
    e = jnp.exp(jnp.where(is_wh, p, 0.0))

    ridx = lax.broadcasted_iota(jnp.int32, (rows, 1), 0)
    gx = (ridx % g).astype(jnp.float32)
    gy = (ridx // g).astype(jnp.float32)

    # Select the (static, grid-scaled) anchor for this block's anchor index.
    aw = jnp.float32(anchors[0][0])
    ah = jnp.float32(anchors[0][1])
    for t in range(1, na):
        aw = jnp.where(a_idx == t, jnp.float32(anchors[t][0]), aw)
        ah = jnp.where(a_idx == t, jnp.float32(anchors[t][1]), ah)

    grid_add = jnp.where(col == 0, gx, gy)
    anc = jnp.where(col == 2, aw, ah)
    box_xy = (sig + grid_add) * stride
    box_wh = e * anc * stride
    o_ref[...] = jnp.where(col < 2, box_xy, jnp.where(col < 4, box_wh, sig))


# ------------------------------------------------------------------ layer wrappers

def conv_bn_act(patches, w_mat, shift, leaky):
    """patches (P, K) x w_mat (K, cout) + shift (cout,), optional LeakyReLU(0.1)."""
    P, K = patches.shape
    cout = w_mat.shape[1]

    # --- tile sizes (fit comfortably inside v5e/v6e/v7x scoped-VMEM budgets) ---
    tp = 256 if (P % 256 == 0 and P >= 512) else 128
    P_pad = _round_up(P, tp)
    cout_pad = _round_up(cout, 128)        # lane-dense output stores
    tn = 256 if (cout_pad % 256 == 0) else 128
    if K > 512:                            # tile the reduction axis for big layers
        tk = 512
        K_pad = _round_up(K, tk)
    else:                                  # small K: single full-K block (no K grid axis work)
        tk = K
        K_pad = K
    kt = K_pad // tk

    # --- host-side padding / bf16 cast (padding is a no-op for aligned shapes) ---
    pmat = patches.astype(jnp.bfloat16)
    if P_pad != P or K_pad != K:
        pmat = jnp.pad(pmat, ((0, P_pad - P), (0, K_pad - K)))
    wmat = w_mat.astype(jnp.bfloat16)
    if K_pad != K or cout_pad != cout:
        wmat = jnp.pad(wmat, ((0, K_pad - K), (0, cout_pad - cout)))
    sh = shift[None, :].astype(jnp.float32)
    if cout_pad != cout:
        sh = jnp.pad(sh, ((0, 0), (0, cout_pad - cout)))

    out = pl.pallas_call(
        functools.partial(_conv_mm_kernel, leaky=leaky),
        out_shape=jax.ShapeDtypeStruct((P_pad, cout_pad), jnp.float32),
        grid=(P_pad // tp, cout_pad // tn, kt),
        in_specs=[
            pl.BlockSpec((tp, tk), lambda i, j, k: (i, k)),
            pl.BlockSpec((tk, tn), lambda i, j, k: (k, j)),
            pl.BlockSpec((1, tn), lambda i, j, k: (0, j)),
        ],
        out_specs=pl.BlockSpec((tp, tn), lambda i, j, k: (i, j)),
        scratch_shapes=[pltpu.VMEM((tp, tn), jnp.float32)],
        compiler_params=pltpu.CompilerParams(
            dimension_semantics=("parallel", "parallel", "arbitrary"),
            vmem_limit_bytes=32 * 1024 * 1024),
    )(pmat, wmat, sh)
    return out[:P, :cout]


def apply_conv(x, p):
    """x is NHWC; returns NHWC."""
    k, s, pad = p["k"], p["stride"], p["pad"]
    n, h, w, cin = x.shape
    cout = p["w"].shape[0]

    if k == 1 and s == 1 and pad == 0:
        ho, wo = h, w
        patches = x.reshape(n * h * w, cin)
    else:
        xp = jnp.pad(x, ((0, 0), (pad, pad), (pad, pad), (0, 0)))
        ho = (h + 2 * pad - k) // s + 1
        wo = (w + 2 * pad - k) // s + 1
        taps = [xp[:, i:i + s * ho:s, j:j + s * wo:s, :]
                for i in range(k) for j in range(k)]
        # tap-major (kh, kw, cin) K ordering; pure concat+reshape, no transpose.
        patches = jnp.concatenate(taps, axis=-1).reshape(n * ho * wo, k * k * cin)

    # weight (cout, cin, kh, kw) -> (kh, kw, cin, cout) -> (K, cout)
    w_mat = p["w"].transpose(2, 3, 1, 0).reshape(k * k * cin, cout)

    if p["bn"]:
        # TODO(synk): BatchNorm uses running statistics (inference mode); PyTorch
        # train-mode batch statistics are not reproduced here.
        inv = 1.0 / jnp.sqrt(p["bn_var"] + 1e-5)
        scale = p["bn_gamma"] * inv
        shift = p["bn_beta"] - p["bn_mean"] * scale
        w_mat = w_mat * scale[None, :]          # fold BN scale into the weights
    else:
        shift = p["bias"]

    out = conv_bn_act(patches, w_mat, shift, p["leaky"])
    return out.reshape(n, ho, wo, cout)


def apply_maxpool(x, k, stride):
    """x is NHWC; tiled lane-dense window-max."""
    n, h, w, c = x.shape
    pad = (k - 1) // 2
    if k == 2 and stride == 1:                  # nn.ZeroPad2d((0, 1, 0, 1)) debug padding
        x = jnp.pad(x, ((0, 0), (0, 1), (0, 1), (0, 0)))
        h, w = h + 1, w + 1
    if pad:
        x = jnp.pad(x, ((0, 0), (pad, pad), (pad, pad), (0, 0)),
                    constant_values=-jnp.inf)
        h, w = h + 2 * pad, w + 2 * pad
    ho = (h - k) // stride + 1
    wo = (w - k) // stride + 1

    taps = [x[:, i:i + stride * ho:stride, j:j + stride * wo:stride, :]
            for i in range(k) for j in range(k)]
    T = n * ho * wo * c
    stacked = jnp.stack(taps, axis=0).reshape(k * k, T)

    rows = -(-T // 128)
    rows8 = _round_up(rows, 8)
    tr = min(rows8, 256)
    rows_pad = _round_up(rows8, tr)
    total = rows_pad * 128
    if total != T:
        stacked = jnp.pad(stacked, ((0, 0), (0, total - T)), constant_values=-jnp.inf)
    stacked = stacked.reshape(k * k, rows_pad, 128)

    out = pl.pallas_call(
        _max_reduce_kernel,
        out_shape=jax.ShapeDtypeStruct((rows_pad, 128), jnp.float32),
        grid=(rows_pad // tr,),
        in_specs=[pl.BlockSpec((k * k, tr, 128), lambda i: (0, i, 0))],
        out_specs=pl.BlockSpec((tr, 128), lambda i: (i, 0)),
        compiler_params=pltpu.CompilerParams(dimension_semantics=("parallel",)),
    )(stacked)
    return out.reshape(-1)[:T].reshape(n, ho, wo, c)


def apply_upsample(x, factor):
    # nearest-neighbor upsample == integer repeat; pure data movement (JAX glue)
    return jnp.repeat(jnp.repeat(x, factor, axis=1), factor, axis=2)


def apply_shortcut(a, b):
    """Tiled lane-dense elementwise add (NHWC tensors of identical shape)."""
    shape = a.shape
    T = a.size
    rows = -(-T // 128)
    rows8 = _round_up(rows, 8)
    tr = min(rows8, 512)
    rows_pad = _round_up(rows8, tr)
    total = rows_pad * 128

    af, bf = a.reshape(-1), b.reshape(-1)
    if total != T:
        af = jnp.pad(af, (0, total - T))
        bf = jnp.pad(bf, (0, total - T))
    a2, b2 = af.reshape(rows_pad, 128), bf.reshape(rows_pad, 128)

    out = pl.pallas_call(
        _add_kernel,
        out_shape=jax.ShapeDtypeStruct((rows_pad, 128), jnp.float32),
        grid=(rows_pad // tr,),
        in_specs=[pl.BlockSpec((tr, 128), lambda i: (i, 0)),
                  pl.BlockSpec((tr, 128), lambda i: (i, 0))],
        out_specs=pl.BlockSpec((tr, 128), lambda i: (i, 0)),
        compiler_params=pltpu.CompilerParams(dimension_semantics=("parallel",)),
    )(a2, b2)
    return out.reshape(-1)[:T].reshape(shape)


def apply_yolo(x, anchors, num_classes, img_dim):
    """x is NHWC (n, g, g, a*(5+nc)); returns (n, a*g*g, 5+nc)."""
    n, g, _, _ = x.shape
    a = len(anchors)
    nc5 = num_classes + 5
    stride = img_dim / g

    # (n, g, g, a, 5+nc) -> (n, a, g, g, 5+nc); tiny glue transpose of the head only.
    pred = x.reshape(n, g, g, a, nc5).transpose(0, 3, 1, 2, 4)
    pred2 = pred.reshape(n * a * g * g, nc5)

    scaled = tuple((float(aw) / stride, float(ah) / stride) for (aw, ah) in anchors)

    out = pl.pallas_call(
        functools.partial(_yolo_kernel, stride=float(stride), g=g, anchors=scaled),
        out_shape=jax.ShapeDtypeStruct((n * a * g * g, nc5), jnp.float32),
        grid=(n * a,),
        in_specs=[pl.BlockSpec((g * g, nc5), lambda i: (i, 0))],
        out_specs=pl.BlockSpec((g * g, nc5), lambda i: (i, 0)),
        compiler_params=pltpu.CompilerParams(dimension_semantics=("parallel",)),
    )(pred2)
    return out.reshape(n, a * g * g, nc5)


# ------------------------------------------------------------------ tiny synthetic cfg
# (Darknet parses a .cfg file; we build an equivalent small module_defs list in-script
#  that exercises conv+bn+leaky, conv+bias, maxpool, shortcut, route, upsample, yolo.)

MODULE_DEFS = [
    {"type": "net", "channels": "4", "height": "16"},
    {"type": "convolutional", "batch_normalize": "1", "filters": "8", "size": "3", "stride": "1", "activation": "leaky"},
    {"type": "maxpool", "size": "2", "stride": "2"},
    {"type": "convolutional", "batch_normalize": "1", "filters": "16", "size": "3", "stride": "1", "activation": "leaky"},
    {"type": "convolutional", "batch_normalize": "1", "filters": "8", "size": "1", "stride": "1", "activation": "leaky"},
    {"type": "shortcut", "from": "-3", "activation": "linear"},
    {"type": "convolutional", "batch_normalize": "0", "filters": "21", "size": "1", "stride": "1", "activation": "linear"},
    {"type": "yolo", "mask": "0,1,2", "anchors": "10,14,23,27,37,58", "classes": "2"},
    {"type": "route", "layers": "-3"},
    {"type": "upsample", "stride": "2"},
    {"type": "route", "layers": "-1,0"},
    {"type": "convolutional", "batch_normalize": "1", "filters": "16", "size": "3", "stride": "1", "activation": "leaky"},
    {"type": "convolutional", "batch_normalize": "0", "filters": "21", "size": "1", "stride": "1", "activation": "linear"},
    {"type": "yolo", "mask": "0,1,2", "anchors": "10,14,23,27,37,58", "classes": "2"},
]


def init_params(module_defs, key):
    hyper = module_defs[0]
    output_filters = [int(hyper["channels"])]
    params = []
    for md in module_defs[1:]:
        p = None
        filters = output_filters[-1]
        if md["type"] == "convolutional":
            bn = int(md["batch_normalize"])
            filters = int(md["filters"])
            k = int(md["size"])
            cin = output_filters[-1]
            key, kw, kb = jax.random.split(key, 3)
            w = jax.random.normal(kw, (filters, cin, k, k), jnp.float32)
            w = w * (0.3 / (cin * k * k) ** 0.5)
            p = {"w": w, "k": k, "stride": int(md["stride"]), "pad": (k - 1) // 2,
                 "bn": bool(bn), "leaky": md["activation"] == "leaky"}
            if bn:
                key, kg, kbt, km, kv = jax.random.split(key, 5)
                p["bn_gamma"] = 1.0 + 0.1 * jax.random.normal(kg, (filters,), jnp.float32)
                p["bn_beta"] = 0.1 * jax.random.normal(kbt, (filters,), jnp.float32)
                p["bn_mean"] = 0.1 * jax.random.normal(km, (filters,), jnp.float32)
                p["bn_var"] = jnp.abs(1.0 + 0.1 * jax.random.normal(kv, (filters,), jnp.float32))
            else:
                p["bias"] = 0.1 * jax.random.normal(kb, (filters,), jnp.float32)
        elif md["type"] == "route":
            layers = [int(v) for v in md["layers"].split(",")]
            filters = sum(output_filters[1:][i] for i in layers)
        elif md["type"] == "shortcut":
            filters = output_filters[1:][int(md["from"])]
        params.append(p)
        output_filters.append(filters)
    return params


class DarknetPallas:
    """JAX/Pallas re-implementation of Darknet.forward (inference, targets=None)."""

    def __init__(self, module_defs, key):
        self.hyperparams = module_defs[0]
        self.module_defs = module_defs[1:]
        self.params = init_params(module_defs, key)

    def forward(self, x):
        # Host interface is NCHW (like PyTorch); convert once to NHWC internally.
        img_dim = x.shape[2]
        x = jnp.transpose(x, (0, 2, 3, 1))
        layer_outputs, yolo_outputs = [], []
        for md, p in zip(self.module_defs, self.params):
            t = md["type"]
            if t == "convolutional":
                x = apply_conv(x, p)
            elif t == "maxpool":
                x = apply_maxpool(x, int(md["size"]), int(md["stride"]))
            elif t == "upsample":
                x = apply_upsample(x, int(md["stride"]))
            elif t == "route":
                x = jnp.concatenate(
                    [layer_outputs[int(li)] for li in md["layers"].split(",")], axis=-1)
            elif t == "shortcut":
                x = apply_shortcut(layer_outputs[-1], layer_outputs[int(md["from"])])
            elif t == "yolo":
                anchor_idxs = [int(v) for v in md["mask"].split(",")]
                aflat = [int(v) for v in md["anchors"].split(",")]
                anchors = [(aflat[i], aflat[i + 1]) for i in range(0, len(aflat), 2)]
                anchors = [anchors[i] for i in anchor_idxs]
                x = apply_yolo(x, anchors, int(md["classes"]), img_dim)
                yolo_outputs.append(x)
            layer_outputs.append(x)
        # TODO(synk): targets!=None loss branch (build_targets / BCE / MSE) not implemented.
        return jnp.concatenate(yolo_outputs, axis=1)


if __name__ == "__main__":
    key = jax.random.PRNGKey(0)
    key_params, key_input = jax.random.split(key)
    model = DarknetPallas(MODULE_DEFS, key_params)

    x = jax.random.normal(key_input, (2, 4, 16, 16), jnp.float32)  # NCHW
    out = model.forward(x)
    out = jax.block_until_ready(out)

    assert out.shape == (2, 3 * 8 * 8 + 3 * 16 * 16, 7), out.shape
    assert out.dtype == jnp.float32
    assert bool(jnp.all(jnp.isfinite(out)))
    print("KERNEL_OK")
</pallas_src>

<mosaic_0001>
module attributes {stable_mosaic.version = 11 : i64} {
  func.func @_conv_mm_kernel(%arg0: i32, %arg1: i32, %arg2: i32, %arg3: memref<256x36xbf16, #tpu.memory_space<vmem>>, %arg4: memref<36x128xbf16, #tpu.memory_space<vmem>>, %arg5: memref<1x128xf32, #tpu.memory_space<vmem>>, %arg6: memref<256x128xf32, #tpu.memory_space<vmem>>, %arg7: memref<256x128xf32, #tpu.memory_space<vmem>>) attributes {dimension_semantics = [#tpu.dimension_semantics<parallel>, #tpu.dimension_semantics<parallel>, #tpu.dimension_semantics<arbitrary>], iteration_bounds = array<i64: 2, 1, 1>, scalar_prefetch = 0 : i64, scratch_operands = 1 : i64, tpu.core_type = #tpu.core_type<tc>, window_params = [{transform_indices = @transform_0, window_bounds = array<i64: 256, 36>}, {transform_indices = @transform_1, window_bounds = array<i64: 36, 128>}, {transform_indices = @transform_2, window_bounds = array<i64: 1, 128>}, {transform_indices = @transform_3, window_bounds = array<i64: 256, 128>}]} {
    %c0_i32 = arith.constant 0 : i32
    %0 = arith.cmpi eq, %arg2, %c0_i32 : i32
    %1 = arith.extui %0 : i1 to i32
    %c0_i32_0 = arith.constant 0 : i32
    %2 = arith.cmpi ne, %1, %c0_i32_0 : i32
    scf.if %2 {
      %cst_10 = arith.constant 0.000000e+00 : f32
      %12 = vector.broadcast %cst_10 : f32 to vector<256x128xf32>
      %c0_11 = arith.constant 0 : index
      %c0_12 = arith.constant 0 : index
      %13 = vector.load %arg7[%c0_11, %c0_12] : memref<256x128xf32, #tpu.memory_space<vmem>>, vector<256x128xf32>
      tpu.vector_store %arg7[%c0_11, %c0_12], %12 {strides = array<i32>} : memref<256x128xf32, #tpu.memory_space<vmem>>, vector<256x128xf32>,
    } else {
    }
    %c0 = arith.constant 0 : index
    %c0_1 = arith.constant 0 : index
    %3 = vector.load %arg7[%c0, %c0_1] : memref<256x128xf32, #tpu.memory_space<vmem>>, vector<256x128xf32>
    %c0_2 = arith.constant 0 : index
    %c0_3 = arith.constant 0 : index
    %4 = vector.load %arg3[%c0_2, %c0_3] : memref<256x36xbf16, #tpu.memory_space<vmem>>, vector<256x36xbf16>
    %c0_4 = arith.constant 0 : index
    %c0_5 = arith.constant 0 : index
    %5 = vector.load %arg4[%c0_4, %c0_5] : memref<36x128xbf16, #tpu.memory_space<vmem>>, vector<36x128xbf16>
    %cst = arith.constant dense<0.000000e+00> : vector<256x128xf32>
    %6 = tpu.matmul %4, %5, %cst {dimension_numbers = #tpu.dot_dimension_numbers<[1], [0], [0], [1], [0, 0, 1, 1], [], []>} : vector<256x36xbf16>, vector<36x128xbf16>, vector<256x128xf32> -> vector<256x128xf32>
    %7 = arith.addf %3, %6 : vector<256x128xf32>
    %c0_6 = arith.constant 0 : index
    %c0_7 = arith.constant 0 : index
    %8 = vector.load %arg7[%c0_6, %c0_7] : memref<256x128xf32, #tpu.memory_space<vmem>>, vector<256x128xf32>
    tpu.vector_store %arg7[%c0_6, %c0_7], %7 {strides = array<i32>} : memref<256x128xf32, #tpu.memory_space<vmem>>, vector<256x128xf32>,
    %c0_i32_8 = arith.constant 0 : i32
    %9 = arith.cmpi eq, %arg2, %c0_i32_8 : i32
    %10 = arith.extui %9 : i1 to i32
    %c0_i32_9 = arith.constant 0 : i32
    %11 = arith.cmpi ne, %10, %c0_i32_9 : i32
    scf.if %11 {
      %c0_10 = arith.constant 0 : index
      %c0_11 = arith.constant 0 : index
      %12 = vector.load %arg7[%c0_10, %c0_11] : memref<256x128xf32, #tpu.memory_space<vmem>>, vector<256x128xf32>
      %c0_12 = arith.constant 0 : index
      %c0_13 = arith.constant 0 : index
      %13 = vector.load %arg5[%c0_12, %c0_13] : memref<1x128xf32, #tpu.memory_space<vmem>>, vector<1x128xf32>
      %14 = vector.broadcast %13 : vector<1x128xf32> to vector<256x128xf32>
      %15 = arith.addf %12, %14 : vector<256x128xf32>
      %cst_14 = arith.constant 0.000000e+00 : f32
      %16 = vector.broadcast %cst_14 : f32 to vector<256x128xf32>
      %17 = arith.cmpf ogt, %15, %16 : vector<256x128xf32>
      %cst_15 = arith.constant 1.000000e-01 : f32
      %18 = vector.broadcast %cst_15 : f32 to vector<256x128xf32>
      %19 = arith.mulf %18, %15 : vector<256x128xf32>
      %20 = arith.select %17, %15, %19 : vector<256x128xi1>, vector<256x128xf32>
      %c0_16 = arith.constant 0 : index
      %c0_17 = arith.constant 0 : index
      %21 = vector.load %arg6[%c0_16, %c0_17] : memref<256x128xf32, #tpu.memory_space<vmem>>, vector<256x128xf32>
      tpu.vector_store %arg6[%c0_16, %c0_17], %20 {strides = array<i32>} : memref<256x128xf32, #tpu.memory_space<vmem>>, vector<256x128xf32>,
    } else {
    }
    return
  }
  func.func @transform_0(%arg0: i32, %arg1: i32, %arg2: i32) -> (i32, i32) {
    %c0_i32 = arith.constant 0 : i32
    return %arg0, %arg2 : i32, i32
  }
  func.func @transform_1(%arg0: i32, %arg1: i32, %arg2: i32) -> (i32, i32) {
    %c0_i32 = arith.constant 0 : i32
    return %arg2, %arg1 : i32, i32
  }
  func.func @transform_2(%arg0: i32, %arg1: i32, %arg2: i32) -> (i32, i32) {
    %c0_i32 = arith.constant 0 : i32
    %c0_i32_0 = arith.constant 0 : i32
    return %c0_i32, %arg1 : i32, i32
  }
  func.func @transform_3(%arg0: i32, %arg1: i32, %arg2: i32) -> (i32, i32) {
    %c0_i32 = arith.constant 0 : i32
    return %arg0, %arg1 : i32, i32
  }
}

</mosaic_0001>

<bundles_post_ra>
// kernel: tpu_custom_call.1
= control target key start
LH: loop header
LB: loop body
LE: loop exit
PB: predicated region body
PF: predicated region fallthrough
CT: control target
= control target key end

     0   :  { %8 = vsyncpa [#allocation4], 0  ;;  %s1584_s0 = inlined_call_operand.vmem [shape: bf16[512,36], index: 0, kind: input, shape index: {}]   ;;  %s1585_s1 = inlined_call_operand.vmem [shape: bf16[36,128], index: 1, kind: input, shape index: {}]   ;;  %s1586_s2 = inlined_call_operand.vmem [shape: f32[1,128], index: 2, kind: input, shape index: {}]   ;;  %s1587_s3 = inlined_call_operand.hbm [shape: f32[512,128], index: 3, kind: output, shape index: {}]  }
   0x1   :  { %10 = vsyncpa [#allocation4 + $0x1], 0  ;;  %s1351_s12 = smov 0   ;;  %s1353_s13 = smov 0  }
   0x2   :  { %s1355_s14 = smov 0   ;;  %s1357_s15 = smov 0  }
   0x3   :  { %s1359_s16 = smov 0   ;;  %s1361_s17 = smov 0  }
   0x4 LB: > { %s1055_s18 = sadd.s32 4294967295, %s1326_s17   ;;  %s1056_s19 = sadd.s32 4294967294, %s1326_s17   ;;  %s1326_s17 = sphi %s1361_s17, %s16_s17   ;;  %s1322_s16 = sphi %s1359_s16, %s1594_s16   ;;  %s1318_s15 = sphi %s1357_s15, %s1593_s15   ;;  %s1314_s14 = sphi %s1355_s14, %s1592_s14   ;;  %s1310_s13 = sphi %s1353_s13, %s1591_s13   ;;  %s1306_s12 = sphi %s1351_s12, %s1590_s12  }
   0x5   : > { %s35_s20 = sadd.s32 1, %s1322_s16  ;;  %s126_s21 = sadd.s32 1, %s1314_s14 }
   0x6   : > { %p37_p0 = scmp.ge.s32.totalorder %s35_s20, 2  ;;  %p136_p1 = scmp.ne.s32.totalorder %s1314_s14, %s1310_s13 }
   0x7   : > { %p137_p2 = scmp.eq.s32.totalorder %s1055_s18, 1  ;;  %p142_p3 = scmp.ne.s32.totalorder %s1310_s13, %s1306_s12 }
   0x8   : > { %s1596_s20 = smov (%p37_p0, %s35_s20), 0  ;;  %p143_p5 = scmp.eq.s32.totalorder %s1056_s19, 1 }
   0x9   : > { %p1391_p4 = por %p137_p2, %p136_p1  ;;  %s121_s23 = ssub.s32 %s1322_s16, %s1596_s20 }
   0xa   : > { %p1061_p6 = scmp.ge.s32.totalorder %s1326_s17, 1  ;;  %p124_p7 = scmp.eq.s32.totalorder %s121_s23, 0 }
   0xb   : > { %p1398_p8 = por %p143_p5, %p142_p3  ;;  %p191_p9 = scmp.lt.s32.totalorder %s1326_s17, 3 }
   0xc   : > { %s1404_s25 = scalar_select %p124_p7, %s1314_s14, %s126_s21  }
   0xd   : > { %p192_p10 = pnand %p1061_p6, %p191_p9 }
   0xe   : > { %v1229_v0 = vld [vmem:[%s1585_s1] sm:$0xff] (!%p192_p10)   ;;  %v1230_v1 = vld [vmem:[%s1585_s1 + $0x8] sm:$0xff] (!%p192_p10)   ;;  %s1063_s30 = sshll.u32 (!%p192_p10), %s1318_s15, 5  ;;  %v1231_v2 = vld [vmem:[%s1585_s1 + $0x10] ss:$0 sps:$4 sm:$0x33] (!%p192_p10)  }
   0xf   : > { %195 = sbr.rel (%p192_p10) target bundleno = 291 (0x123), region = 32  ;;  %1126 = vmatprep.subr.bf16.mxu0 (!%p192_p10), %v1229_v0  ;;  %1164 = vmatprep.subr.bf16.mxu1 (!%p192_p10), %v1229_v0  ;;  %p230_p11 = scmp.lt.s32.totalorder (!%p192_p10), %s1063_s30, 63  ;;  %vm501_vm0 = vcmask (!%p192_p10), 1041408   ;;  %vm452_vm1 = vcmask (!%p192_p10), 293888   ;;  %v1457_v20 = vld [vmem:[%s1586_s2] ss:$0 sm:$0xff] (!%p192_p10) }
  0x10   : > { %1127 = vmatpush3.bf16.msra.mxu0 (!%p192_p10), %v1229_v0  ;;  %1167 = vmatpush3.bf16.msra.mxu1 (!%p192_p10), %v1229_v0  ;;  %v503_v3 = vsel (!%p192_p10), %vm501_vm0, %v1231_v2, 0  ;;  %s226_s10 = sand.u32 (!%p192_p10), 1, %s1310_s13   ;;  %s1106_s23 = sshll.u32 (!%p192_p10), %s1318_s15, 12 }
  0x11   : > { %1128 = vmatprep.subr.bf16.mxu0 (!%p192_p10), %v1230_v1  ;;  %1165 = vmatprep.subr.bf16.mxu1 (!%p192_p10), %v1230_v1  ;;  %s1062_s19 = sshll.u32 (!%p192_p10), %s226_s10, 8  ;;  %s1528_s28 = scalar_lea.hbm (!%p192_p10), %s1587_s3, %s1106_s23 }
  0x12   : > { %s1467_s21 = scalar_lea.vmem (!%p192_p10), [#allocation3], %s1062_s19  ;;  %s1538_s29 = scalar_lea.sflag (!%p192_p10), [#allocation4], %s226_s10 }
  0x13   : > { %s947_s26 = sshll.u32 (!%p192_p10), %s1467_s21, 4  ;;  %s1328_s4 = smov (!%p192_p10), [#allocation3]   ;;  %s1530_s26 = int_to_ptr.vmem [resolvable:$true] %s947_s26 }
  0x14   : > { %1129 = vmatpush3.bf16.msra.mxu0 (!%p192_p10), %v1230_v1  ;;  %1168 = vmatpush3.bf16.msra.mxu1 (!%p192_p10), %v1230_v1  ;;  %s1252_s5 = sshll.u32 (!%p192_p10), %s1328_s4, 4  ;;  %s1253_s5 = int_to_ptr.vmem [resolvable:$false] %s1252_s5 }
  0x15   : > { %1170 = vmatprep.subr.msk.bf16.mxu0 (!%p192_p10), %vm501_vm0, %v1231_v2  ;;  %1171 = vmatprep.subr.msk.bf16.mxu1 (!%p192_p10), %vm501_vm0, %v1231_v2  ;;  %p1255_p1 = scmp.lt.s32.totalorder (!%p192_p10), %s1530_s26, %s1253_s5 }
  0x16   : > { %s1598_s30 = smov (!%p230_p11, %s1063_s30), 63 }
  0x17   : > { %s1064_s6 = sshll.u32 %s1598_s30, 2  ;;  %s1248_s30 = scalar_lea.vmem %s1530_s26, 4096 }
  0x18   : > { %s1419_s9 = scalar_lea.vmem %s1584_s0, %s1064_s6  ;;  %1131 = vmatpush3.bf16.msra.mxu0 %v503_v3  ;;  %1169 = vmatpush3.bf16.msra.mxu1 %v503_v3  ;;  %p1249_p12 = scmp.ne.s32.totalorder %s1530_s26, %s1248_s30 }
  0x19   : > { %v1232_v4 = vld [vmem:[%s1419_s9] sm:$0xff]   ;;  %v1234_v6 = vld [vmem:[%s1419_s9 + $0x8] sm:$0xff]   ;;  %v1236_v8 = vld [vmem:[%s1419_s9 + $0x10] sm:$0xff]   ;;  %s1254_s6 = scalar_lea.vmem %s1253_s5, 8192 }
  0x1a   : > { %v1233_v5 = vld [vmem:[%s1419_s9 + $0x40] sm:$0xff]   ;;  %1132 = vmatprep.mubr.msk.bf16.mxu0 %vm452_vm1, %v1232_v4  ;;  %v1235_v7 = vld [vmem:[%s1419_s9 + $0x48] sm:$0xff]   ;;  %v1237_v9 = vld [vmem:[%s1419_s9 + $0x50] sm:$0xff]   ;;  %p1250_p13 = pnand %p1249_p12, %p1391_p4  ;;  %p1256_p2 = scmp.lt.s32.totalorder %s1254_s6, %s1248_s30 }
  0x1b   : > { %1148 = vmatprep.mubr.msk.bf16.mxu1 %vm452_vm1, %v1233_v5  ;;  %1133 = vmatmul.mubr.msk.bf16.vlgmr.msra.gmra.mrb[0].mxu0 %vm452_vm1, %v1234_v6  ;;  %v1238_v10 = vld [vmem:[%s1419_s9 + $0x18] sm:$0xff]   ;;  %v1240_v12 = vld [vmem:[%s1419_s9 + $0x20] sm:$0xff]   ;;  %v1242_v14 = vld [vmem:[%s1419_s9 + $0x28] sm:$0xff]  }
  0x1c   : > { %1149 = vmatmul.mubr.msk.bf16.vlgmr.msra.gmra.mrb[0].mxu1 %vm452_vm1, %v1235_v7  ;;  %1136 = vmatprep.mubr.msk.bf16.mxu0 %vm452_vm1, %v1236_v8  ;;  %v1239_v11 = vld [vmem:[%s1419_s9 + $0x58] sm:$0xff]   ;;  %v1241_v13 = vld [vmem:[%s1419_s9 + $0x60] sm:$0xff]   ;;  %v1243_v15 = vld [vmem:[%s1419_s9 + $0x68] sm:$0xff]   ;;  %p1251_p0 = pneg %p1250_p13  ;;  %p1257_p3 = por %p1256_p2, %p1255_p1 }
  0x1d   : > { %1152 = vmatprep.mubr.msk.bf16.mxu1 %vm452_vm1, %v1237_v9  ;;  %v1244_v16 = vld [vmem:[%s1419_s9 + $0x30] sm:$0xff]   ;;  %v1246_v18 = vld [vmem:[%s1419_s9 + $0x38] sm:$0xff]  }
  0x1e   : > { %v1245_v17 = vld [vmem:[%s1419_s9 + $0x70] sm:$0xff]   ;;  %v1247_v19 = vld [vmem:[%s1419_s9 + $0x78] sm:$0xff]   ;;  %p1258_p5 = pnand %p1257_p3, %p1251_p0 }
  0x23   : > { %1137 = vmatmul.mubr.msk.bf16.gmra.mrb[4].mxu0 %vm452_vm1, %v1238_v10 }
  0x24   : > { %1153 = vmatmul.mubr.msk.bf16.gmra.mrb[4].mxu1 %vm452_vm1, %v1239_v11  ;;  %1140 = vmatprep.mubr.msk.bf16.mxu0 %vm452_vm1, %v1240_v12 }
  0x25   : > { %1156 = vmatprep.mubr.msk.bf16.mxu1 %vm452_vm1, %v1241_v13 }
  0x2b   : > { %1141 = vmatmul.mubr.msk.bf16.gmra.mrb[8].mxu0 %vm452_vm1, %v1242_v14 }
  0x2c   : > { %1157 = vmatmul.mubr.msk.bf16.gmra.mrb[8].mxu1 %vm452_vm1, %v1243_v15  ;;  %1144 = vmatprep.mubr.msk.bf16.mxu0 %vm452_vm1, %v1244_v16 }
  0x2d   : > { %1160 = vmatprep.mubr.msk.bf16.mxu1 %vm452_vm1, %v1245_v17 }
  0x33   : > { %1145 = vmatmul.mubr.msk.bf16.gmra.mrb[12].mxu0 %vm452_vm1, %v1246_v18 }
  0x34   : > { %1161 = vmatmul.mubr.msk.bf16.gmra.mrb[12].mxu1 %vm452_vm1, %v1247_v19 }
  0xee   : > { %v1134_v21 = vpop.f32.mrb[0].mxu0 }
  0xef   : > { %v1150_v22 = vpop.f32.mrb[0].mxu1  ;;  %v774_v23 = vadd.f32 %v1134_v21, %v1457_v20  ;;  %v539_v25 = vpop.f32.mrb[1].mxu0 }
  0xf0   : > { %v790_v24 = vadd.f32 %v1150_v22, %v1457_v20  ;;  %v603_v26 = vpop.f32.mrb[1].mxu1  ;;  %v772_v27 = vadd.f32 %v1457_v20, %v539_v25  ;;  %v1135_v29 = vpop.f32.mrb[2].mxu0 }
  0xf1   : > { %v788_v28 = vadd.f32 %v1457_v20, %v603_v26  ;;  %v1151_v30 = vpop.f32.mrb[2].mxu1  ;;  %vm806_vm2 = vcmp.gt.f32.partialorder %v774_v23, 0.0  ;;  %v838_v31 = vmul.f32 0.1, %v774_v23  ;;  %v775_v37 = vadd.f32 %v1135_v29, %v1457_v20  ;;  %v542_v39 = vpop.f32.mrb[3].mxu0 }
  0xf2   : > { %vm822_vm3 = vcmp.gt.f32.partialorder %v790_v24, 0.0  ;;  %v854_v32 = vmul.f32 0.1, %v790_v24  ;;  %vm804_vm4 = vcmp.gt.f32.partialorder %v772_v27, 0.0  ;;  %v836_v33 = vmul.f32 0.1, %v772_v27 }
  0xf3   : > { %vm820_vm5 = vcmp.gt.f32.partialorder %v788_v28, 0.0  ;;  %v852_v34 = vmul.f32 0.1, %v788_v28  ;;  %v870_v35 = vsel %vm806_vm2, %v774_v23, %v838_v31  ;;  %v791_v38 = vadd.f32 %v1151_v30, %v1457_v20  ;;  %v606_v40 = vpop.f32.mrb[3].mxu1 }
  0xf4   : > { %v886_v36 = vsel %vm822_vm3, %v790_v24, %v854_v32  ;;  %902 = vst [vmem:[%s1467_s21 + $0x10] sm:$0xff] %v870_v35  ;;  %v868_v41 = vsel %vm804_vm4, %v772_v27, %v836_v33  ;;  %v773_v43 = vadd.f32 %v1457_v20, %v542_v39  ;;  %v789_v44 = vadd.f32 %v1457_v20, %v606_v40 }
  0xf5   : > { %918 = vst [vmem:[%s1467_s21 + $0x90] sm:$0xff] %v886_v36  ;;  %v884_v42 = vsel %vm820_vm5, %v788_v28, %v852_v34  ;;  %900 = vst [vmem:[%s1467_s21] sm:$0xff] %v868_v41  ;;  %vm807_vm6 = vcmp.gt.f32.partialorder %v775_v37, 0.0  ;;  %v839_v45 = vmul.f32 0.1, %v775_v37  ;;  %vm823_vm7 = vcmp.gt.f32.partialorder %v791_v38, 0.0 }
  0xf6   : > { %916 = vst [vmem:[%s1467_s21 + $0x80] sm:$0xff] %v884_v42  ;;  %v855_v46 = vmul.f32 0.1, %v791_v38  ;;  %vm805_vm8 = vcmp.gt.f32.partialorder %v773_v43, 0.0  ;;  %v837_v47 = vmul.f32 0.1, %v773_v43 }
  0xf7   : > { %vm821_vm9 = vcmp.gt.f32.partialorder %v789_v44, 0.0  ;;  %v853_v48 = vmul.f32 0.1, %v789_v44  ;;  %v871_v49 = vsel %vm807_vm6, %v775_v37, %v839_v45  ;;  %v1138_v51 = vpop.f32.mrb[4].mxu0  ;;  %v1154_v52 = vpop.f32.mrb[4].mxu1 }
  0xf8   : > { %v887_v50 = vsel %vm823_vm7, %v791_v38, %v855_v46  ;;  %903 = vst [vmem:[%s1467_s21 + $0x18] sm:$0xff] %v871_v49  ;;  %v869_v53 = vsel %vm805_vm8, %v773_v43, %v837_v47  ;;  %v778_v55 = vadd.f32 %v1138_v51, %v1457_v20  ;;  %v794_v56 = vadd.f32 %v1154_v52, %v1457_v20  ;;  %v555_v57 = vpop.f32.mrb[5].mxu0  ;;  %v619_v58 = vpop.f32.mrb[5].mxu1 }
  0xf9   : > { %919 = vst [vmem:[%s1467_s21 + $0x98] sm:$0xff] %v887_v50  ;;  %v885_v54 = vsel %vm821_vm9, %v789_v44, %v853_v48  ;;  %901 = vst [vmem:[%s1467_s21 + $0x8] sm:$0xff] %v869_v53  ;;  %v776_v59 = vadd.f32 %v1457_v20, %v555_v57  ;;  %v792_v60 = vadd.f32 %v1457_v20, %v619_v58  ;;  %v1139_v61 = vpop.f32.mrb[6].mxu0  ;;  %v1155_v62 = vpop.f32.mrb[6].mxu1 }
  0xfa   : > { %917 = vst [vmem:[%s1467_s21 + $0x88] sm:$0xff] %v885_v54  ;;  %vm810_vm10 = vcmp.gt.f32.partialorder %v778_v55, 0.0  ;;  %v842_v63 = vmul.f32 0.1, %v778_v55  ;;  %vm826_vm11 = vcmp.gt.f32.partialorder %v794_v56, 0.0  ;;  %v779_v5 = vadd.f32 %v1139_v61, %v1457_v20  ;;  %v558_v7 = vpop.f32.mrb[7].mxu0 }
  0xfb   : > { %v858_v0 = vmul.f32 0.1, %v794_v56  ;;  %vm808_vm12 = vcmp.gt.f32.partialorder %v776_v59, 0.0  ;;  %v840_v1 = vmul.f32 0.1, %v776_v59  ;;  %vm824_vm13 = vcmp.gt.f32.partialorder %v792_v60, 0.0 }
  0xfc   : > { %v856_v2 = vmul.f32 0.1, %v792_v60  ;;  %v874_v3 = vsel %vm810_vm10, %v778_v55, %v842_v63  ;;  %v795_v6 = vadd.f32 %v1155_v62, %v1457_v20  ;;  %v622_v8 = vpop.f32.mrb[7].mxu1  ;;  %v777_v11 = vadd.f32 %v1457_v20, %v558_v7 }
  0xfd   : > { %v890_v4 = vsel %vm826_vm11, %v794_v56, %v858_v0  ;;  %906 = vst [vmem:[%s1467_s21 + $0x30] sm:$0xff] %v874_v3  ;;  %v872_v9 = vsel %vm808_vm12, %v776_v59, %v840_v1  ;;  %v793_v12 = vadd.f32 %v1457_v20, %v622_v8  ;;  %vm811_vm14 = vcmp.gt.f32.partialorder %v779_v5, 0.0 }
  0xfe   : > { %922 = vst [vmem:[%s1467_s21 + $0xb0] sm:$0xff] %v890_v4  ;;  %v888_v10 = vsel %vm824_vm13, %v792_v60, %v856_v2  ;;  %904 = vst [vmem:[%s1467_s21 + $0x20] sm:$0xff] %v872_v9  ;;  %v843_v13 = vmul.f32 0.1, %v779_v5  ;;  %vm827_vm15 = vcmp.gt.f32.partialorder %v795_v6, 0.0  ;;  %vm809_vm0 = vcmp.gt.f32.partialorder %v777_v11, 0.0 }
  0xff   : > { %920 = vst [vmem:[%s1467_s21 + $0xa0] sm:$0xff] %v888_v10  ;;  %v859_v14 = vmul.f32 0.1, %v795_v6  ;;  %v841_v15 = vmul.f32 0.1, %v777_v11  ;;  %vm825_vm1 = vcmp.gt.f32.partialorder %v793_v12, 0.0 }
 0x100   : > { %v857_v16 = vmul.f32 0.1, %v793_v12  ;;  %v875_v17 = vsel %vm811_vm14, %v779_v5, %v843_v13  ;;  %v1142_v19 = vpop.f32.mrb[8].mxu0  ;;  %v1158_v21 = vpop.f32.mrb[8].mxu1 }
 0x101   : > { %v891_v18 = vsel %vm827_vm15, %v795_v6, %v859_v14  ;;  %907 = vst [vmem:[%s1467_s21 + $0x38] sm:$0xff] %v875_v17  ;;  %v873_v22 = vsel %vm809_vm0, %v777_v11, %v841_v15  ;;  %v782_v24 = vadd.f32 %v1142_v19, %v1457_v20  ;;  %v798_v25 = vadd.f32 %v1158_v21, %v1457_v20  ;;  %v571_v26 = vpop.f32.mrb[9].mxu0  ;;  %v635_v27 = vpop.f32.mrb[9].mxu1 }
 0x102   : > { %923 = vst [vmem:[%s1467_s21 + $0xb8] sm:$0xff] %v891_v18  ;;  %v889_v23 = vsel %vm825_vm1, %v793_v12, %v857_v16  ;;  %905 = vst [vmem:[%s1467_s21 + $0x28] sm:$0xff] %v873_v22  ;;  %v780_v28 = vadd.f32 %v1457_v20, %v571_v26  ;;  %v796_v29 = vadd.f32 %v1457_v20, %v635_v27  ;;  %v1143_v30 = vpop.f32.mrb[10].mxu0  ;;  %v1159_v31 = vpop.f32.mrb[10].mxu1 }
 0x103   : > { %921 = vst [vmem:[%s1467_s21 + $0xa8] sm:$0xff] %v889_v23  ;;  %vm814_vm2 = vcmp.gt.f32.partialorder %v782_v24, 0.0  ;;  %v846_v32 = vmul.f32 0.1, %v782_v24  ;;  %vm830_vm3 = vcmp.gt.f32.partialorder %v798_v25, 0.0  ;;  %v783_v38 = vadd.f32 %v1143_v30, %v1457_v20  ;;  %v574_v40 = vpop.f32.mrb[11].mxu0 }
 0x104   : > { %v862_v33 = vmul.f32 0.1, %v798_v25  ;;  %vm812_vm4 = vcmp.gt.f32.partialorder %v780_v28, 0.0  ;;  %v844_v34 = vmul.f32 0.1, %v780_v28  ;;  %vm828_vm5 = vcmp.gt.f32.partialorder %v796_v29, 0.0 }
 0x105   : > { %v860_v35 = vmul.f32 0.1, %v796_v29  ;;  %v878_v36 = vsel %vm814_vm2, %v782_v24, %v846_v32  ;;  %v799_v39 = vadd.f32 %v1159_v31, %v1457_v20  ;;  %v638_v41 = vpop.f32.mrb[11].mxu1  ;;  %v781_v44 = vadd.f32 %v1457_v20, %v574_v40 }
 0x106   : > { %v894_v37 = vsel %vm830_vm3, %v798_v25, %v862_v33  ;;  %910 = vst [vmem:[%s1467_s21 + $0x50] sm:$0xff] %v878_v36  ;;  %v876_v42 = vsel %vm812_vm4, %v780_v28, %v844_v34  ;;  %v797_v45 = vadd.f32 %v1457_v20, %v638_v41  ;;  %v1146_v46 = vpop.f32.mrb[12].mxu0  ;;  %vm815_vm6 = vcmp.gt.f32.partialorder %v783_v38, 0.0 }
 0x107   : > { %926 = vst [vmem:[%s1467_s21 + $0xd0] sm:$0xff] %v894_v37  ;;  %v892_v43 = vsel %vm828_vm5, %v796_v29, %v860_v35  ;;  %v1162_v47 = vpop.f32.mrb[12].mxu1  ;;  %908 = vst [vmem:[%s1467_s21 + $0x40] sm:$0xff] %v876_v42  ;;  %v847_v48 = vmul.f32 0.1, %v783_v38  ;;  %vm831_vm7 = vcmp.gt.f32.partialorder %v799_v39, 0.0  ;;  %v786_v54 = vadd.f32 %v1146_v46, %v1457_v20 }
 0x108   : > { %924 = vst [vmem:[%s1467_s21 + $0xc0] sm:$0xff] %v892_v43  ;;  %v863_v49 = vmul.f32 0.1, %v799_v39  ;;  %vm813_vm8 = vcmp.gt.f32.partialorder %v781_v44, 0.0  ;;  %v845_v50 = vmul.f32 0.1, %v781_v44  ;;  %v802_v55 = vadd.f32 %v1162_v47, %v1457_v20 }
 0x109   : > { %vm829_vm9 = vcmp.gt.f32.partialorder %v797_v45, 0.0  ;;  %v861_v51 = vmul.f32 0.1, %v797_v45  ;;  %v879_v52 = vsel %vm815_vm6, %v783_v38, %v847_v48  ;;  %v587_v56 = vpop.f32.mrb[13].mxu0  ;;  %v651_v57 = vpop.f32.mrb[13].mxu1  ;;  %vm818_vm10 = vcmp.gt.f32.partialorder %v786_v54, 0.0 }
 0x10a   : > { %v895_v53 = vsel %vm831_vm7, %v799_v39, %v863_v49  ;;  %911 = vst [vmem:[%s1467_s21 + $0x58] sm:$0xff] %v879_v52  ;;  %v877_v58 = vsel %vm813_vm8, %v781_v44, %v845_v50  ;;  %v784_v60 = vadd.f32 %v1457_v20, %v587_v56  ;;  %v800_v61 = vadd.f32 %v1457_v20, %v651_v57  ;;  %v1147_v62 = vpop.f32.mrb[14].mxu0  ;;  %v1163_v63 = vpop.f32.mrb[14].mxu1 }
 0x10b   : > { %927 = vst [vmem:[%s1467_s21 + $0xd8] sm:$0xff] %v895_v53  ;;  %v893_v59 = vsel %vm829_vm9, %v797_v45, %v861_v51  ;;  %909 = vst [vmem:[%s1467_s21 + $0x48] sm:$0xff] %v877_v58  ;;  %v850_v0 = vmul.f32 0.1, %v786_v54  ;;  %vm834_vm11 = vcmp.gt.f32.partialorder %v802_v55, 0.0  ;;  %v787_v6 = vadd.f32 %v1147_v62, %v1457_v20  ;;  %v590_v8 = vpop.f32.mrb[15].mxu0 }
 0x10c   : > { %925 = vst [vmem:[%s1467_s21 + $0xc8] sm:$0xff] %v893_v59  ;;  %v866_v1 = vmul.f32 0.1, %v802_v55  ;;  %vm816_vm12 = vcmp.gt.f32.partialorder %v784_v60, 0.0  ;;  %v848_v2 = vmul.f32 0.1, %v784_v60  ;;  %v803_v7 = vadd.f32 %v1163_v63, %v1457_v20 }
 0x10d   : > { %vm832_vm13 = vcmp.gt.f32.partialorder %v800_v61, 0.0  ;;  %v864_v3 = vmul.f32 0.1, %v800_v61  ;;  %v882_v4 = vsel %vm818_vm10, %v786_v54, %v850_v0  ;;  %v654_v9 = vpop.f32.mrb[15].mxu1  ;;  %v785_v12 = vadd.f32 %v1457_v20, %v590_v8 }
 0x10e   : > { %v898_v5 = vsel %vm834_vm11, %v802_v55, %v866_v1  ;;  %914 = vst [vmem:[%s1467_s21 + $0x70] sm:$0xff] %v882_v4  ;;  %v880_v10 = vsel %vm816_vm12, %v784_v60, %v848_v2  ;;  %v801_v13 = vadd.f32 %v1457_v20, %v654_v9  ;;  %vm819_vm14 = vcmp.gt.f32.partialorder %v787_v6, 0.0 }
 0x10f   : > { %930 = vst [vmem:[%s1467_s21 + $0xf0] sm:$0xff] %v898_v5  ;;  %v896_v11 = vsel %vm832_vm13, %v800_v61, %v864_v3  ;;  %912 = vst [vmem:[%s1467_s21 + $0x60] sm:$0xff] %v880_v10  ;;  %v851_v14 = vmul.f32 0.1, %v787_v6  ;;  %vm835_vm15 = vcmp.gt.f32.partialorder %v803_v7, 0.0  ;;  %vm817_vm0 = vcmp.gt.f32.partialorder %v785_v12, 0.0 }
 0x110   : > { %928 = vst [vmem:[%s1467_s21 + $0xe0] sm:$0xff] %v896_v11  ;;  %v867_v15 = vmul.f32 0.1, %v803_v7  ;;  %v849_v16 = vmul.f32 0.1, %v785_v12  ;;  %vm833_vm1 = vcmp.gt.f32.partialorder %v801_v13, 0.0 }
 0x111   : > { %v865_v17 = vmul.f32 0.1, %v801_v13  ;;  %v883_v20 = vsel %vm819_vm14, %v787_v6, %v851_v14 }
 0x112   : > { %v899_v18 = vsel %vm835_vm15, %v803_v7, %v867_v15  ;;  %915 = vst [vmem:[%s1467_s21 + $0x78] sm:$0xff] %v883_v20  ;;  %v881_v19 = vsel %vm817_vm0, %v785_v12, %v849_v16 }
 0x113   : > { %931 = vst [vmem:[%s1467_s21 + $0xf8] sm:$0xff] %v899_v18  ;;  %v897_v21 = vsel %vm833_vm1, %v801_v13, %v865_v17  ;;  %913 = vst [vmem:[%s1467_s21 + $0x68] sm:$0xff] %v881_v19 }
 0x114   : > { %929 = vst [vmem:[%s1467_s21 + $0xe8] sm:$0xff] %v897_v21 }
 0x115   : > { %1261 = shalt.err (!%p1258_p5)
}
 0x116   : > { %s1262_s7 = scalar_lea.hbm %s1528_s28, 4096  ;;  %s1266_s10 = scalar_lea.hbm %s1587_s3, 8192 }
 0x117   : > { %p1263_p6 = scmp.ne.s32.totalorder %s1528_s28, %s1262_s7  ;;  %p1267_p10 = scmp.lt.u32.totalorder %s1528_s28, %s1587_s3 }
 0x118   : > { %p1268_p11 = scmp.lt.u32.totalorder %s1266_s10, %s1262_s7  ;;  %p1270_p13 = scmp.lt.u32.totalorder %s1262_s7, %s1528_s28 }
 0x119   : > { %p1264_p7 = pnand %p1263_p6, %p1391_p4 }
 0x11a   : > { %p1269_p12 = por %p1268_p11, %p1267_p10 }
 0x11b   : > { %p1265_p9 = pneg %p1264_p7 }
 0x11c   : > { %p1271_p0 = por %p1270_p13, %p1269_p12 }
 0x11e   : > { %p1272_p1 = pnand %p1271_p0, %p1265_p9 }
 0x120   : > { %1275 = shalt.err (!%p1272_p1)
}
 0x121   : > { %s1329_s19 = smov 128   ;;  %s1330_s21 = smov 8  }
 0x122   : > { %1172 = dma.vmem_to_hbm [thread:$0]  (%p1391_p4), %s1530_s26, 4096, %s1528_s28, %s1538_s29, %s1329_s19, %s1329_s19, %s1330_s21  }
 0x123 PF: > { %p1178_p2 = scmp.ge.s32.totalorder %s1326_s17, 2  ;;  %s962_s23 = sand.u32 1, %s1306_s12  }
 0x124   : > { %s963_s15 = scalar_lea.sflag [#allocation4], %s962_s23 }
 0x125   : > { %p1175_p3 = pnand %p1178_p2, %p1398_p8 }
 0x127   : > { %1301 = dma.done.wait (!%p1175_p3), %s963_s15, 4096  }
 0x128   : > { %1303 = vsyncadd (!%p1175_p3), %s963_s15, 4294963200  ;;  %s16_s17 = sadd.s32 1, %s1326_s17   ;;  %s1590_s12 = smov %s1310_s13 }
 0x129   : > { %p13_p5 = scmp.ge.s32.totalorder %s16_s17, 4   ;;  %s1591_s13 = smov %s1314_s14 }
 0x12a   : > { %s1592_s14 = smov %s1404_s25  ;;  %s1593_s15 = smov %s1322_s16 }
 0x12b   : > { %s1594_s16 = smov %s1596_s20  ;;  %15 = sbr.rel (!%p13_p5) target bundleno = 4 (0x4), region = 81 }
 0x132   :  { %968 = vsyncpa [#allocation4], 1 }
 0x133   :  { %970 = vsyncpa [#allocation4 + $0x1], 1 }

</bundles_post_ra>
